<compile_context>
chip_gen: v7x
topology: tpu7x:2x2x1
jax: 0.10.0
libtpu: 0.0.40
codegen_flags: <defaults>
</compile_context>

<pallas_src>
import functools

import jax
import jax.numpy as jnp
import numpy as np
from jax.experimental import pallas as pl
from jax.experimental.pallas import tpu as pltpu


def _cdiv(a, b):
    return -(-a // b)


def _round_up(x, mult):
    return ((x + mult - 1) // mult) * mult


def _adsh_loss_kernel(f_ref, bq_ref, bt_ref, s_ref, out_ref, acc_ref, q_ref,
                      *, code_length, gamma, m, n, tn, tiles_per_slice):
    """Grid: (slice of database axis ["parallel"], n-tile within slice ["arbitrary"]).

    f_ref  : (m, K)   f32  sampled relaxed codes       (resident across grid)
    bq_ref : (m, K)   f32  B[omega, :]                 (resident across grid)
    bt_ref : (K, tn)  int8 lane-dense tile of B.T
    s_ref  : (m, tn)  int8 tile of the similarity matrix
    out_ref: (1,8,128) f32 per-slice partials: [0,0,0]=hash partial, [0,0,1]=quant
    acc_ref: (m, 128) VMEM f32 lane-folded accumulator of err**2
    q_ref  : (1,)     SMEM f32 quantization squared-error (computed per slice)
    """
    c = pl.program_id(0)
    j = pl.program_id(1)

    @pl.when(j == 0)
    def _init():
        acc_ref[...] = jnp.zeros_like(acc_ref)
        d = f_ref[...] - bq_ref[...]
        q_ref[0] = jnp.sum(d * d)

    # B and S entries are exactly +/-1 -> int8 is exact; widen to f32 on the
    # VPU so the arithmetic matches the f32 reference.
    s = s_ref[...].astype(jnp.float32)
    bt = bt_ref[...].astype(jnp.float32)
    err = code_length * s - jnp.dot(f_ref[...], bt,
                                    preferred_element_type=jnp.float32)

    # Mask columns past n (remainder tile / fully-out-of-range extra tiles)
    # using the UNclamped logical column index.
    col0 = (c * tiles_per_slice + j) * tn
    col = col0 + jax.lax.broadcasted_iota(jnp.int32, err.shape, 1)
    err = jnp.where(col < n, err, 0.0)

    # Lane-fold err**2 into the (m, 128) accumulator: vreg-aligned static
    # slices + VPU adds, no per-step cross-lane (XLU) reduce.
    e2 = err * err
    folded = e2[:, 0:128]
    for blk in range(1, tn // 128):
        folded = folded + e2[:, blk * 128:(blk + 1) * 128]
    acc_ref[...] += folded

    @pl.when(j == pl.num_programs(1) - 1)
    def _finalize():
        denom = float(m) * float(n)
        hash_partial = jnp.sum(acc_ref[...]) / denom / code_length * 12.0
        quant = q_ref[0] / denom * gamma / code_length * 12.0
        sub = jax.lax.broadcasted_iota(jnp.int32, (8, 128), 0)
        lane = jax.lax.broadcasted_iota(jnp.int32, (8, 128), 1)
        tile = jnp.where((sub == 0) & (lane == 0), hash_partial,
                         jnp.where((sub == 0) & (lane == 1), quant, 0.0))
        out_ref[0] = tile


def pack_adsh_constants(B, S):
    """Pack B (transposed, lane-dense) and S as int8 — do this ONCE and reuse.

    Precondition: every entry of B and S is exactly -1, 0 or +1 (standard for
    ADSH binary codes / similarity); otherwise precision would be lost.
    """
    B_T_i8 = jnp.asarray(B).T.astype(jnp.int8)   # (K, n), database dim on lanes
    S_i8 = jnp.asarray(S).astype(jnp.int8)       # (m, n)
    return B_T_i8, S_i8


def adsh_loss(F, B, S, omega, *, code_length, gamma, tn=1024, num_slices=2,
              packed=None):
    m, K = F.shape
    n, Kb = B.shape
    assert K == code_length and Kb == code_length
    assert S.shape == (m, n)
    assert n >= 128, "database axis must cover at least one lane tile"

    if packed is None:
        # Fallback (unamortized). Prefer calling pack_adsh_constants() once per
        # ADSH outer iteration and passing the result here.
        packed = pack_adsh_constants(B, S)
    B_T_i8, S_i8 = packed

    F32 = F.astype(jnp.float32)
    B_omega = B[omega, :].astype(jnp.float32)   # tiny (m, K) gather, JAX glue

    # Lane-dense tile width: multiple of 128, no larger than each slice's share
    # of n (tiny demo shapes -> a single tile per slice).
    tn = max(128, min(tn, _round_up(_cdiv(n, num_slices), 128)))
    n_tiles = _cdiv(n, tn)
    tiles_per_slice = _cdiv(n_tiles, num_slices)

    kernel = functools.partial(
        _adsh_loss_kernel, code_length=code_length, gamma=gamma,
        m=m, n=n, tn=tn, tiles_per_slice=tiles_per_slice)

    def col_map(c, j):
        # Clamp so fully-out-of-range extra tiles re-read the last real tile;
        # their contribution is masked to exactly zero in-kernel.
        return (0, jnp.minimum(c * tiles_per_slice + j, n_tiles - 1))

    # Explicit scoped-VMEM budget: double-buffered int8 tiles + resident f32
    # F / B[omega] + folded accumulator + output tile, with headroom.
    vmem_bytes = (2 * (m * tn + K * tn)      # int8 S / B.T tiles, double-buffered
                  + 4 * m * K * 4            # F and B[omega], double-buffered f32
                  + m * 128 * 4              # lane-folded accumulator
                  + 2 * 8 * 128 * 4)         # output tile
    vmem_limit = min(max(int(1.5 * vmem_bytes) + (2 << 20), 32 << 20), 48 << 20)

    flops = 2 * m * n * K + 6 * m * n + 3 * m * K
    bytes_accessed = (F32.size * 4 + B_omega.size * 4 + B_T_i8.size
                      + S_i8.size + num_slices * 8 * 128 * 4)

    # TODO(synk): mark the resident F / B[omega] specs single-buffered
    # (pipeline_mode=pl.Buffered(1)) to reclaim their second VMEM buffer once
    # that path is exercised on all target generations.
    partials = pl.pallas_call(
        kernel,
        out_shape=jax.ShapeDtypeStruct((num_slices, 8, 128), jnp.float32),
        grid_spec=pltpu.PrefetchScalarGridSpec(
            num_scalar_prefetch=0,
            grid=(num_slices, tiles_per_slice),
            in_specs=[
                pl.BlockSpec((m, K), lambda c, j: (0, 0)),   # F        (resident)
                pl.BlockSpec((m, K), lambda c, j: (0, 0)),   # B[omega] (resident)
                pl.BlockSpec((K, tn), col_map),              # B.T tile (int8)
                pl.BlockSpec((m, tn), col_map),              # S tile   (int8)
            ],
            out_specs=pl.BlockSpec((1, 8, 128), lambda c, j: (c, 0, 0)),
            scratch_shapes=[
                pltpu.VMEM((m, 128), jnp.float32),   # lane-folded err**2 acc
                pltpu.SMEM((1,), jnp.float32),       # quantization sq-error
            ],
        ),
        compiler_params=pltpu.CompilerParams(
            dimension_semantics=("parallel", "arbitrary"),
            vmem_limit_bytes=vmem_limit),
        cost_estimate=pl.CostEstimate(
            flops=flops, transcendentals=0, bytes_accessed=bytes_accessed),
    )(F32, B_omega, B_T_i8, S_i8)

    hash_loss = jnp.sum(partials[:, 0, 0])   # sum of per-slice partials
    quant_loss = partials[0, 0, 1]           # identical across slices; take slice 0
    loss = hash_loss + quant_loss
    return loss, hash_loss, quant_loss


def adsh_loss_ref(F, B, S, omega, *, code_length, gamma):
    """Pure-JAX reference mirroring the PyTorch module exactly."""
    m, n = F.shape[0], B.shape[0]
    hash_loss = jnp.sum((code_length * S - F @ B.T) ** 2) / (m * n) / code_length * 12
    quant_loss = jnp.sum((F - B[omega, :]) ** 2) / (m * n) * gamma / code_length * 12
    return hash_loss + quant_loss, hash_loss, quant_loss


if __name__ == "__main__":
    code_length = 32
    gamma = 200.0
    m, n = 8, 640  # sampled points, database points (exercises tiling + remainder mask)

    key = jax.random.PRNGKey(0)
    kf, kb, ks, ko = jax.random.split(key, 4)

    # F: relaxed (tanh-like) codes; B: binary +/-1 codes; S: +/-1 similarity.
    F = jnp.tanh(jax.random.normal(kf, (m, code_length), dtype=jnp.float32))
    B = jnp.sign(jax.random.normal(kb, (n, code_length), dtype=jnp.float32))
    B = jnp.where(B == 0, 1.0, B)
    S = jnp.where(jax.random.uniform(ks, (m, n)) > 0.5, 1.0, -1.0).astype(jnp.float32)
    omega = jax.random.randint(ko, (m,), 0, n, dtype=jnp.int32)

    # Pack the +/-1 constants once (reused across ADSH inner iterations).
    packed = pack_adsh_constants(B, S)

    loss, hash_loss, quant_loss = adsh_loss(
        F, B, S, omega, code_length=code_length, gamma=gamma, packed=packed)
    jax.block_until_ready((loss, hash_loss, quant_loss))

    ref = adsh_loss_ref(F, B, S, omega, code_length=code_length, gamma=gamma)
    np.testing.assert_allclose(np.array(loss), np.array(ref[0]), rtol=1e-4)
    np.testing.assert_allclose(np.array(hash_loss), np.array(ref[1]), rtol=1e-4)
    np.testing.assert_allclose(np.array(quant_loss), np.array(ref[2]), rtol=1e-4)

    print("KERNEL_OK")
</pallas_src>

<mosaic_0001>
module attributes {stable_mosaic.version = 11 : i64} {
  func.func @_adsh_loss_kernel(%arg0: i32, %arg1: i32, %arg2: memref<8x32xf32, #tpu.memory_space<vmem>>, %arg3: memref<8x32xf32, #tpu.memory_space<vmem>>, %arg4: memref<32x384xi8, #tpu.memory_space<vmem>>, %arg5: memref<8x384xi8, #tpu.memory_space<vmem>>, %arg6: memref<1x8x128xf32, #tpu.memory_space<vmem>>, %arg7: memref<8x128xf32, #tpu.memory_space<vmem>>, %arg8: memref<1xf32, #tpu.memory_space<smem>>) attributes {dimension_semantics = [#tpu.dimension_semantics<parallel>, #tpu.dimension_semantics<arbitrary>], iteration_bounds = array<i64: 2, 1>, scalar_prefetch = 0 : i64, scratch_operands = 2 : i64, tpu.core_type = #tpu.core_type<tc>, window_params = [{pipeline_mode = #tpu.pipeline_mode<synchronous>, transform_indices = @transform_0, window_bounds = array<i64: 8, 32>}, {pipeline_mode = #tpu.pipeline_mode<synchronous>, transform_indices = @transform_1, window_bounds = array<i64: 8, 32>}, {transform_indices = @transform_2, window_bounds = array<i64: 32, 384>}, {transform_indices = @transform_3, window_bounds = array<i64: 8, 384>}, {transform_indices = @transform_4, window_bounds = array<i64: 1, 8, 128>}]} {
    %c0_i32 = arith.constant 0 : i32
    %0 = arith.cmpi eq, %arg1, %c0_i32 : i32
    %1 = arith.extui %0 : i1 to i32
    %c0_i32_0 = arith.constant 0 : i32
    %2 = arith.cmpi ne, %1, %c0_i32_0 : i32
    scf.if %2 {
      %cst_14 = arith.constant 0.000000e+00 : f32
      %34 = vector.broadcast %cst_14 : f32 to vector<8x128xf32>
      %c0_15 = arith.constant 0 : index
      %c0_16 = arith.constant 0 : index
      %35 = vector.load %arg7[%c0_15, %c0_16] : memref<8x128xf32, #tpu.memory_space<vmem>>, vector<8x128xf32>
      tpu.vector_store %arg7[%c0_15, %c0_16], %34 {strides = array<i32>} : memref<8x128xf32, #tpu.memory_space<vmem>>, vector<8x128xf32>,
      %c0_17 = arith.constant 0 : index
      %c0_18 = arith.constant 0 : index
      %36 = vector.load %arg2[%c0_17, %c0_18] : memref<8x32xf32, #tpu.memory_space<vmem>>, vector<8x32xf32>
      %c0_19 = arith.constant 0 : index
      %c0_20 = arith.constant 0 : index
      %37 = vector.load %arg3[%c0_19, %c0_20] : memref<8x32xf32, #tpu.memory_space<vmem>>, vector<8x32xf32>
      %38 = arith.subf %36, %37 : vector<8x32xf32>
      %39 = arith.mulf %38, %38 : vector<8x32xf32>
      %40 = vector.shape_cast %39 : vector<8x32xf32> to vector<1x8x32xf32>
      %cst_21 = arith.constant dense<0.000000e+00> : vector<1xf32>
      %41 = vector.multi_reduction <add>, %40, %cst_21 [1, 2] : vector<1x8x32xf32> to vector<1xf32>
      %42 = vector.shape_cast %41 : vector<1xf32> to vector<1x1x1xf32>
      %43 = vector.extract %42[0, 0, 0] : f32 from vector<1x1x1xf32>
      %c0_22 = arith.constant 0 : index
      %44 = memref.load %arg8[%c0_22] : memref<1xf32, #tpu.memory_space<smem>>
      memref.store %43, %arg8[%c0_22] : memref<1xf32, #tpu.memory_space<smem>>
    } else {
    }
    %c0 = arith.constant 0 : index
    %c0_1 = arith.constant 0 : index
    %3 = vector.load %arg5[%c0, %c0_1] : memref<8x384xi8, #tpu.memory_space<vmem>>, vector<8x384xi8>
    %4 = arith.sitofp %3 : vector<8x384xi8> to vector<8x384xf32>
    %c0_2 = arith.constant 0 : index
    %c0_3 = arith.constant 0 : index
    %5 = vector.load %arg4[%c0_2, %c0_3] : memref<32x384xi8, #tpu.memory_space<vmem>>, vector<32x384xi8>
    %6 = arith.sitofp %5 : vector<32x384xi8> to vector<32x384xf32>
    %cst = arith.constant 3.200000e+01 : f32
    %7 = vector.broadcast %cst : f32 to vector<8x384xf32>
    %8 = arith.mulf %7, %4 : vector<8x384xf32>
    %c0_4 = arith.constant 0 : index
    %c0_5 = arith.constant 0 : index
    %9 = vector.load %arg2[%c0_4, %c0_5] : memref<8x32xf32, #tpu.memory_space<vmem>>, vector<8x32xf32>
    %cst_6 = arith.constant dense<0.000000e+00> : vector<8x384xf32>
    %10 = tpu.matmul %9, %6, %cst_6 {dimension_numbers = #tpu.dot_dimension_numbers<[1], [0], [0], [1], [0, 0, 1, 1], [], []>} : vector<8x32xf32>, vector<32x384xf32>, vector<8x384xf32> -> vector<8x384xf32>
    %11 = arith.subf %8, %10 : vector<8x384xf32>
    %c1_i32 = arith.constant 1 : i32
    %12 = arith.muli %arg0, %c1_i32 : i32
    %13 = arith.addi %12, %arg1 : i32
    %c384_i32 = arith.constant 384 : i32
    %14 = arith.muli %13, %c384_i32 : i32
    %15 = tpu.iota {dimensions = array<i32: 1>} : vector<8x384xi32>
    %16 = vector.broadcast %14 : i32 to vector<8x384xi32>
    %17 = arith.addi %16, %15 : vector<8x384xi32>
    %c640_i32 = arith.constant 640 : i32
    %18 = vector.broadcast %c640_i32 : i32 to vector<8x384xi32>
    %19 = arith.cmpi slt, %17, %18 : vector<8x384xi32>
    %cst_7 = arith.constant 0.000000e+00 : f32
    %20 = vector.broadcast %cst_7 : f32 to vector<8x384xf32>
    %21 = arith.select %19, %11, %20 : vector<8x384xi1>, vector<8x384xf32>
    %22 = arith.mulf %21, %21 : vector<8x384xf32>
    %23 = vector.extract_strided_slice %22 {offsets = [0, 0], sizes = [8, 128], strides = [1, 1]} : vector<8x384xf32> to vector<8x128xf32>
    %24 = vector.extract_strided_slice %22 {offsets = [0, 128], sizes = [8, 128], strides = [1, 1]} : vector<8x384xf32> to vector<8x128xf32>
    %25 = arith.addf %23, %24 : vector<8x128xf32>
    %26 = vector.extract_strided_slice %22 {offsets = [0, 256], sizes = [8, 128], strides = [1, 1]} : vector<8x384xf32> to vector<8x128xf32>
    %27 = arith.addf %25, %26 : vector<8x128xf32>
    %c0_8 = arith.constant 0 : index
    %c0_9 = arith.constant 0 : index
    %28 = vector.load %arg7[%c0_8, %c0_9] : memref<8x128xf32, #tpu.memory_space<vmem>>, vector<8x128xf32>
    %29 = arith.addf %28, %27 : vector<8x128xf32>
    %c0_10 = arith.constant 0 : index
    %c0_11 = arith.constant 0 : index
    %30 = vector.load %arg7[%c0_10, %c0_11] : memref<8x128xf32, #tpu.memory_space<vmem>>, vector<8x128xf32>
    tpu.vector_store %arg7[%c0_10, %c0_11], %29 {strides = array<i32>} : memref<8x128xf32, #tpu.memory_space<vmem>>, vector<8x128xf32>,
    %c0_i32_12 = arith.constant 0 : i32
    %31 = arith.cmpi eq, %arg1, %c0_i32_12 : i32
    %32 = arith.extui %31 : i1 to i32
    %c0_i32_13 = arith.constant 0 : i32
    %33 = arith.cmpi ne, %32, %c0_i32_13 : i32
    scf.if %33 {
      %c0_14 = arith.constant 0 : index
      %c0_15 = arith.constant 0 : index
      %34 = vector.load %arg7[%c0_14, %c0_15] : memref<8x128xf32, #tpu.memory_space<vmem>>, vector<8x128xf32>
      %35 = vector.shape_cast %34 : vector<8x128xf32> to vector<1x8x128xf32>
      %cst_16 = arith.constant dense<0.000000e+00> : vector<1xf32>
      %36 = vector.multi_reduction <add>, %35, %cst_16 [1, 2] : vector<1x8x128xf32> to vector<1xf32>
      %37 = vector.shape_cast %36 : vector<1xf32> to vector<1x1x1xf32>
      %38 = vector.extract %37[0, 0, 0] : f32 from vector<1x1x1xf32>
      %cst_17 = arith.constant 5.120000e+03 : f32
      %39 = arith.divf %38, %cst_17 : f32
      %cst_18 = arith.constant 3.200000e+01 : f32
      %40 = arith.divf %39, %cst_18 : f32
      %cst_19 = arith.constant 1.200000e+01 : f32
      %41 = arith.mulf %40, %cst_19 : f32
      %c0_20 = arith.constant 0 : index
      %42 = memref.load %arg8[%c0_20] : memref<1xf32, #tpu.memory_space<smem>>
      %cst_21 = arith.constant 5.120000e+03 : f32
      %43 = arith.divf %42, %cst_21 : f32
      %cst_22 = arith.constant 2.000000e+02 : f32
      %44 = arith.mulf %43, %cst_22 : f32
      %cst_23 = arith.constant 3.200000e+01 : f32
      %45 = arith.divf %44, %cst_23 : f32
      %cst_24 = arith.constant 1.200000e+01 : f32
      %46 = arith.mulf %45, %cst_24 : f32
      %47 = tpu.iota {dimensions = array<i32: 0>} : vector<8x128xi32>
      %48 = tpu.iota {dimensions = array<i32: 1>} : vector<8x128xi32>
      %c0_i32_25 = arith.constant 0 : i32
      %49 = vector.broadcast %c0_i32_25 : i32 to vector<8x128xi32>
      %50 = arith.cmpi eq, %47, %49 : vector<8x128xi32>
      %c0_i32_26 = arith.constant 0 : i32
      %51 = vector.broadcast %c0_i32_26 : i32 to vector<8x128xi32>
      %52 = arith.cmpi eq, %48, %51 : vector<8x128xi32>
      %53 = arith.andi %50, %52 : vector<8x128xi1>
      %c0_i32_27 = arith.constant 0 : i32
      %54 = vector.broadcast %c0_i32_27 : i32 to vector<8x128xi32>
      %55 = arith.cmpi eq, %47, %54 : vector<8x128xi32>
      %c1_i32_28 = arith.constant 1 : i32
      %56 = vector.broadcast %c1_i32_28 : i32 to vector<8x128xi32>
      %57 = arith.cmpi eq, %48, %56 : vector<8x128xi32>
      %58 = arith.andi %55, %57 : vector<8x128xi1>
      %cst_29 = arith.constant 0.000000e+00 : f32
      %59 = vector.broadcast %46 : f32 to vector<8x128xf32>
      %60 = vector.broadcast %cst_29 : f32 to vector<8x128xf32>
      %61 = arith.select %58, %59, %60 : vector<8x128xi1>, vector<8x128xf32>
      %62 = vector.broadcast %41 : f32 to vector<8x128xf32>
      %63 = arith.select %53, %62, %61 : vector<8x128xi1>, vector<8x128xf32>
      %c0_30 = arith.constant 0 : index
      %c0_31 = arith.constant 0 : index
      %c0_32 = arith.constant 0 : index
      %64 = vector.load %arg6[%c0_30, %c0_31, %c0_32] : memref<1x8x128xf32, #tpu.memory_space<vmem>>, vector<1x8x128xf32>
      %65 = vector.shape_cast %64 : vector<1x8x128xf32> to vector<8x128xf32>
      %66 = vector.shape_cast %63 : vector<8x128xf32> to vector<1x8x128xf32>
      tpu.vector_store %arg6[%c0_30, %c0_31, %c0_32], %66 {strides = array<i32>} : memref<1x8x128xf32, #tpu.memory_space<vmem>>, vector<1x8x128xf32>,
    } else {
    }
    return
  }
  func.func @transform_0(%arg0: i32, %arg1: i32) -> (i32, i32) {
    %c0_i32 = arith.constant 0 : i32
    %c0_i32_0 = arith.constant 0 : i32
    %c0_i32_1 = arith.constant 0 : i32
    return %c0_i32, %c0_i32_0 : i32, i32
  }
  func.func @transform_1(%arg0: i32, %arg1: i32) -> (i32, i32) {
    %c0_i32 = arith.constant 0 : i32
    %c0_i32_0 = arith.constant 0 : i32
    %c0_i32_1 = arith.constant 0 : i32
    return %c0_i32, %c0_i32_0 : i32, i32
  }
  func.func @transform_2(%arg0: i32, %arg1: i32) -> (i32, i32) {
    %c1_i32 = arith.constant 1 : i32
    %0 = arith.muli %arg0, %c1_i32 : i32
    %1 = arith.addi %0, %arg1 : i32
    %c1_i32_0 = arith.constant 1 : i32
    %2 = arith.minsi %1, %c1_i32_0 : i32
    %c0_i32 = arith.constant 0 : i32
    %c0_i32_1 = arith.constant 0 : i32
    return %c0_i32, %2 : i32, i32
  }
  func.func @transform_3(%arg0: i32, %arg1: i32) -> (i32, i32) {
    %c1_i32 = arith.constant 1 : i32
    %0 = arith.muli %arg0, %c1_i32 : i32
    %1 = arith.addi %0, %arg1 : i32
    %c1_i32_0 = arith.constant 1 : i32
    %2 = arith.minsi %1, %c1_i32_0 : i32
    %c0_i32 = arith.constant 0 : i32
    %c0_i32_1 = arith.constant 0 : i32
    return %c0_i32, %2 : i32, i32
  }
  func.func @transform_4(%arg0: i32, %arg1: i32) -> (i32, i32, i32) {
    %c0_i32 = arith.constant 0 : i32
    %c0_i32_0 = arith.constant 0 : i32
    %c0_i32_1 = arith.constant 0 : i32
    return %arg0, %c0_i32, %c0_i32_0 : i32, i32, i32
  }
}

</mosaic_0001>

<bundles_post_ra>
// kernel: tpu_custom_call.1
= control target key start
LH: loop header
LB: loop body
LE: loop exit
PB: predicated region body
PF: predicated region fallthrough
CT: control target
= control target key end

     0   :  { %9 = vsyncpa [#allocation5], 0  ;;  %s1419_s0 = inlined_call_operand.hbm [shape: f32[8,32], index: 0, kind: input, shape index: {}]   ;;  %s1420_s1 = inlined_call_operand.hbm [shape: f32[8,32], index: 1, kind: input, shape index: {}]   ;;  %s1421_s2 = inlined_call_operand.hbm [shape: s8[32,640], index: 2, kind: input, shape index: {}]   ;;  %s1422_s3 = inlined_call_operand.vmem [shape: s8[8,640], index: 3, kind: input, shape index: {}]   ;;  %s1423_s4 = inlined_call_operand.hbm [shape: f32[2,8,128], index: 4, kind: output, shape index: {}]  }
   0x1   :  { %10 = vsyncpa [#allocation8], 0 }
   0x2   :  { %11 = vsyncpa [#allocation6], 0 }
   0x3   :  { %13 = vsyncpa [#allocation6 + $0x1], 0  ;;  %s1128_s15 = smov 0   ;;  %s1130_s16 = smov 0  }
   0x4   :  { %s1132_s17 = smov 0   ;;  %s1134_s18 = smov 0  }
   0x5   :  { %s1136_s19 = smov 0   ;;  %s1138_s20 = smov 0  }
   0x6   :  { %s1140_s21 = smov 0   ;;  %s1142_s22 = smov 0  }
   0x7   :  { %s1144_s23 = smov 0  }
   0x8 LB: > { %1431 = sst [smem:[#allocation15_spill]] %s1090_s22  ;;  %s1172_s24 = sadd.s32 4294967295, %s1094_s23   ;;  %s1094_s23 = sphi %s1144_s23, %s19_s23   ;;  %s1090_s22 = sphi %s1142_s22, %s1454_s22   ;;  %s1086_s21 = sphi %s1140_s21, %s1453_s21   ;;  %s1082_s20 = sphi %s1138_s20, %s1460_s20   ;;  %s1078_s19 = sphi %s1136_s19, %s1459_s19   ;;  %s1074_s18 = sphi %s1134_s18, %s1458_s18   ;;  %s1070_s17 = sphi %s1132_s17, %s1457_s17   ;;  %s1066_s16 = sphi %s1130_s16, %s1456_s16   ;;  %s1062_s15 = sphi %s1128_s15, %s1455_s15  }
   0x9   : > { %s732_s25 = sadd.s32 4294967294, %s1094_s23   ;;  %s31_s26 = sadd.s32 1, %s1090_s22 }
   0xa   : > { %p78_p0 = scmp.lt.s32.totalorder %s1090_s22, 1  ;;  %p33_p1 = scmp.ge.s32.totalorder %s31_s26, 2 }
   0xb   : > { %s86_s27 = sadd.s32 1, %s1082_s20  ;;  %p93_p2 = scmp.ne.s32.totalorder %s1082_s20, %s1078_s19 }
   0xc   : > { %s1179_s28 = scalar_select %p78_p0, %s1090_s22, 1 }
   0xd   : > { %s1462_s26 = smov (%p33_p1, %s31_s26), 0  ;;  %p94_p3 = scmp.eq.s32.totalorder %s1094_s23, 0 }
   0xe   : > { %1432 = sst [smem:[#allocation16_spill]] %s1462_s26  ;;  %p81_p4 = scmp.lt.s32.totalorder %s1462_s26, 1 }
   0xf   : > { %p99_p5 = scmp.ne.s32.totalorder %s1078_s19, %s1074_s18  ;;  %p1188_p6 = por %p94_p3, %p93_p2 }
  0x10   : > { %p1426_p7 = scmp.eq.s32.totalorder %s1172_s24, 0  ;;  %s141_s6 = ssub.s32 %s1090_s22, %s1462_s26 }
  0x11   : > { %s1433_s29 = scalar_select %p1188_p6, 1, 0 }
  0x12   : > { %s82_s30 = scalar_select %p81_p4, %s1462_s26, 1 }
  0x13   : > { %p1196_p8 = por %p1426_p7, %p99_p5  ;;  %p142_p9 = scmp.eq.s32.totalorder %s141_s6, 0 }
  0x14   : > { %s83_s7 = ssub.s32 %s1179_s28, %s82_s30  ;;  %s144_s8 = sadd.s32 1, %s1070_s17 }
  0x15   : > { %s1434_s5 = scalar_select %p1196_p8, 1, 0 }
  0x16   : > { %p84_p10 = scmp.eq.s32.totalorder %s83_s7, 0  ;;  %p154_p11 = scmp.ne.s32.totalorder %s1070_s17, %s1066_s16 }
  0x17   : > { %s1205_s9 = scalar_select %p142_p9, %s1070_s17, %s144_s8  }
  0x18   : > { %s1208_s10 = scalar_select %p84_p10, %s1082_s20, %s86_s27  }
  0x19   : > { %1435 = sst [smem:[#allocation17_spill]] %s1205_s9  ;;  %p155_p12 = scmp.eq.s32.totalorder %s1172_s24, 1 }
  0x1a   : > { %1436 = sst [smem:[#allocation18_spill]] %s1208_s10  ;;  %p160_p13 = scmp.ne.s32.totalorder %s1066_s16, %s1062_s15 }
  0x1b   : > { %p161_p0 = scmp.eq.s32.totalorder %s732_s25, 1  ;;  %p1215_p1 = por %p155_p12, %p154_p11 }
  0x1c   : > { %p733_p2 = scmp.ge.s32.totalorder %s1094_s23, 1  ;;  %p168_p4 = scmp.lt.s32.totalorder %s1094_s23, 3 }
  0x1d   : > { %s1437_s11 = scalar_select %p1215_p1, 1, 0 }
  0x1e   : > { %p1220_p3 = por %p161_p0, %p160_p13  ;;  %p1225_p5 = pnand %p733_p2, %p168_p4 }
  0x1f   : > { %s1096_s14 = smov [#allocation4]   ;;  %s1097_s25 = smov [#allocation7]  }
  0x20   : > { %s1438_s12 = scalar_select %p1220_p3, 1, 0 }
  0x21   : > { %s1439_s13 = scalar_select %p1225_p5, 1, 0 }
  0x22   : > { %s181_s18 = sshll.u32 %s1096_s14, 4  ;;  %p803_p9 = pneg %p1225_p5  ;;  %s182_s18 = int_to_ptr.vmem [resolvable:$true] %s181_s18 }
  0x23   : > { %s192_s27 = sshll.u32 %s1097_s25, 4  ;;  %s896_s8 = scalar_lea.hbm %s1419_s0, 128  ;;  %s1237_s27 = int_to_ptr.vmem [resolvable:$true] %s192_s27 }
  0x24   : > { %p1233_p10 = pnand %p803_p9, %p1426_p7  ;;  %p897_p11 = scmp.ne.s32.totalorder %s1419_s0, %s896_s8 }
  0x25   : > { %p903_p2 = scmp.lt.u32.totalorder %s896_s8, %s1419_s0 }
  0x26   : > { %p898_p12 = pneg %p1233_p10 }
  0x28   : > { %p899_p13 = pnand %p898_p12, %p897_p11 }
  0x2a   : > { %p900_p0 = pneg %p899_p13 }
  0x2c   : > { %p905_p4 = pnand %p903_p2, %p900_p0 }
  0x2e   : > { %908 = shalt.err (!%p905_p4)
}
  0x2f   : > { %s909_s10 = scalar_lea.vmem %s182_s18, 128  ;;  %p917_p1 = scmp.lt.s32.totalorder %s182_s18, %s182_s18 }
  0x30   : > { %p910_p9 = scmp.ne.s32.totalorder %s182_s18, %s909_s10  ;;  %p918_p8 = scmp.lt.s32.totalorder %s909_s10, %s909_s10 }
  0x32   : > { %p912_p7 = pnand %p910_p9, %p898_p12  ;;  %p919_p5 = por %p918_p8, %p917_p1 }
  0x34   : > { %p913_p3 = pneg %p912_p7 }
  0x36   : > { %p920_p6 = pnand %p919_p5, %p913_p3 }
  0x38   : > { %923 = shalt.err (!%p920_p6)
}
  0x39   : > { %806 = dma.hbm_to_vmem [thread:$0]  (!%p1233_p10), %s1419_s0, 128, %s182_s18, [#allocation5]  }
  0x3a   : > { %s924_s8 = scalar_lea.hbm %s1420_s1, 128 }
  0x3b   : > { %p925_p7 = scmp.ne.s32.totalorder %s1420_s1, %s924_s8  ;;  %p931_p6 = scmp.lt.u32.totalorder %s924_s8, %s1420_s1 }
  0x3d   : > { %p927_p8 = pnand %p925_p7, %p898_p12 }
  0x3f   : > { %p928_p1 = pneg %p927_p8 }
  0x41   : > { %p933_p3 = pnand %p931_p6, %p928_p1 }
  0x43   : > { %936 = shalt.err (!%p933_p3)
}
  0x44   : > { %s937_s18 = scalar_lea.vmem %s1237_s27, 128  ;;  %p945_p0 = scmp.lt.s32.totalorder %s1237_s27, %s1237_s27 }
  0x45   : > { %p938_p5 = scmp.ne.s32.totalorder %s1237_s27, %s937_s18  ;;  %p946_p2 = scmp.lt.s32.totalorder %s937_s18, %s937_s18 }
  0x47   : > { %p940_p11 = pnand %p938_p5, %p898_p12  ;;  %p947_p4 = por %p946_p2, %p945_p0 }
  0x49   : > { %p941_p13 = pneg %p940_p11 }
  0x4b   : > { %p948_p9 = pnand %p947_p4, %p941_p13 }
  0x4d   : > { %951 = shalt.err (!%p948_p9)
}
  0x4e   : > { %809 = dma.hbm_to_vmem [thread:$0]  (!%p1233_p10), %s1420_s1, 128, %s1237_s27, [#allocation8]  }
  0x4f   : > { %p1430_p7 = scmp.ge.s32.totalorder %s1094_s23, 2 }
  0x50   : > { %p1441_p12 = scmp.ne.s32.totalorder (!%p1430_p7), %s1433_s29, 0 }
  0x51   : > { %199 = sbr.rel (%p1430_p7) target bundleno = 122 (0x7a), region = 24 }
  0x58   : > { %202 = sbr.rel (!%p1441_p12) target bundleno = 122 (0x7a), region = 28  ;;  %s203_s6 = sand.u32 (%p1441_p12), 1, %s1094_s23  }
  0x59   : > { %s205_s22 = sand.u32 (%p1441_p12), 1, %s1082_s20   ;;  %s211_s30 = smul.u32 (%p1441_p12), 3, %s1179_s28 }
  0x5a   : > { %s786_s7 = smul.u32 (%p1441_p12), 24, %s205_s22  ;;  %s1297_s25 = scalar_lea.sflag (%p1441_p12), [#allocation5], %s203_s6 }
  0x5b   : > { %s212_s8 = ssub.s32 (%p1441_p12), 5, %s211_s30 }
  0x5c   : > { %p213_p8 = scmp.lt.s32.totalorder (%p1441_p12), %s212_s8, 3  ;;  %s207_s10 = scalar_lea.vmem (%p1441_p12), [#allocation9], %s786_s7 }
  0x5f   : > { %s1464_s8 = smov (!%p213_p8, %s212_s8), 3 }
  0x60   : > { %s1294_s14 = sshll.u32 %s1464_s8, 7 }
  0x61   : > { %s217_s27 = ssub.s32 384, %s1294_s14 }
  0x62   : > { %218 = vsyncadd %s1297_s25, %s217_s27  ;;  %p738_p10 = scmp.ne.s32.totalorder %s1294_s14, 0  ;;  %s753_s29 = smul.u32 384, %s1179_s28 }
  0x63   : > { %s224_s18 = sshll.u32 %s207_s10, 4  ;;  %s956_s28 = scalar_lea.hbm %s1421_s2, 640  ;;  %s225_s18 = int_to_ptr.vmem [resolvable:$true] %s224_s18 }
  0x64   : > { %s1305_s22 = scalar_lea.hbm %s1421_s2, %s753_s29 }
  0x65   : > { %s952_s6 = scalar_lea.hbm %s1305_s22, %s1294_s14  ;;  %p957_p5 = scmp.lt.u32.totalorder %s1305_s22, %s1421_s2 }
  0x66   : > { %p953_p1 = scmp.ne.s32.totalorder %s1305_s22, %s952_s6  ;;  %p958_p11 = scmp.lt.u32.totalorder %s956_s28, %s952_s6 }
  0x67   : > { %p960_p0 = scmp.lt.u32.totalorder %s952_s6, %s1305_s22 }
  0x68   : > { %p954_p6 = pnand %p953_p1, %p738_p10  ;;  %p959_p13 = por %p958_p11, %p957_p5 }
  0x6a   : > { %p955_p3 = pneg %p954_p6  ;;  %p961_p2 = por %p960_p0, %p959_p13 }
  0x6c   : > { %p962_p4 = pnand %p961_p2, %p955_p3 }
  0x6e   : > { %965 = shalt.err (!%p962_p4)
}
  0x6f   : > { %s966_s10 = scalar_lea.vmem %s225_s18, %s1294_s14  ;;  %s1098_s29 = smov [#allocation9]  }
  0x70   : > { %p967_p9 = scmp.ne.s32.totalorder %s225_s18, %s966_s10  ;;  %s970_s9 = sshll.u32 %s1098_s29, 4  ;;  %s971_s9 = int_to_ptr.vmem [resolvable:$false] %s970_s9 }
  0x71   : > { %s972_s26 = scalar_lea.vmem %s971_s9, 768  ;;  %p973_p1 = scmp.lt.s32.totalorder %s225_s18, %s971_s9 }
  0x72   : > { %p968_p12 = pnand %p967_p9, %p738_p10  ;;  %p974_p6 = scmp.lt.s32.totalorder %s972_s26, %s966_s10 }
  0x74   : > { %p969_p8 = pneg %p968_p12  ;;  %p975_p7 = por %p974_p6, %p973_p1 }
  0x76   : > { %p976_p5 = pnand %p975_p7, %p969_p8 }
  0x78   : > { %979 = shalt.err (!%p976_p5)
}
  0x79   : > { %227 = dma.hbm_to_vmem [thread:$0]  (%p738_p10), %s1305_s22, %s1294_s14, %s225_s18, %s1297_s25  }
  0x7a PF: > { %p1442_p3 = scmp.ne.s32.totalorder %s1439_s13, 0 }
  0x7b   : > { %p1443_p11 = scmp.eq.s32.totalorder (!%p1442_p3), %s1172_s24, 0 }
  0x7c   : > { %256 = sbr.rel (%p1442_p3) target bundleno = 599 (0x257), region = 36 }
  0x83   : > { %1045 = dma.done.wait (%p1443_p11), [#allocation5], 128   ;;  %p1444_p13 = pmov %p1443_p11 }
  0x84   : > { %p1445_p7 = pmov %p1443_p11 }
  0x85   : > { %1047 = vsyncadd (%p1444_p13), [#allocation5], 4294967168 }
  0x86   : > { %1049 = dma.done.wait (%p1445_p7), [#allocation8], 128   ;;  %p1446_p0 = pmov %p1445_p7 }
  0x87   : > { %s266_s14 = sand.u32 1, %s1172_s24   ;;  %s268_s25 = sand.u32 1, %s1078_s19  }
  0x88   : > { %1051 = vsyncadd (%p1446_p0), [#allocation8], 4294967168  ;;  %s787_s18 = smul.u32 24, %s268_s25  ;;  %s267_s13 = scalar_lea.sflag [#allocation5], %s266_s14 }
  0x89   : > { %p1447_p10 = scmp.ne.s32.totalorder %s1434_s5, 0 }
  0x8a   : > { %s270_s22 = scalar_lea.vmem [#allocation9], %s787_s18 }
  0x8b   : > { %1053 = dma.done.wait (%p1447_p10), %s267_s13, 384  }
  0x8c   : > { %1055 = vsyncadd (%p1447_p10), %s267_s13, 4294966912  ;;  %v1099_v0 = vmov 0.0|0.0   ;;  %v1100_v1 = vmov 0.0   ;;  %vm1101_vm0 = vmmov 0   ;;  %v365_v2 = vld [vmem:[%s270_s22 + $0x8] sm:$0xff]  ;;  %v364_v3 = vld [vmem:[%s270_s22] sm:$0xff]  ;;  %v545_v16 = vlaneseq }
  0x8d   : > { %778 = vmatprep.subr.bf16.mxu1 %v1099_v0  ;;  %463 = vmatprep.mubr.f32.mxu0 %v1100_v1  ;;  %v366_v4 = vld [vmem:[%s270_s22 + $0x10] sm:$0xff]  ;;  %v770_v5 = vunpack.c.l.s8.bf16 %v365_v2  ;;  %v774_v6 = vunpack.c.h.s8.bf16 %v365_v2  ;;  %v772_v7 = vunpack.c.l.s8.bf16 %v364_v3  ;;  %v776_v9 = vunpack.c.h.s8.bf16 %v364_v3  ;;  %v341_v12 = vld [vmem:[#allocation7] sm:$0xff]  ;;  %p316_p2 = scmp.lt.s32.totalorder %s1086_s21, 1  ;;  %s544_s8 = smul.u32 384, %s1086_s21 }
  0x8e   : > { %767 = vmatprep.mubr.msk.f32.mxu1 %vm1101_vm0, %v1100_v1  ;;  %v784_v8 = vunpack.c.l.s8.bf16 %v366_v4  ;;  %v785_v10 = vunpack.c.h.s8.bf16 %v366_v4  ;;  %vm344_vm1 = vcmask 261120   ;;  %v394_v11 = vld [vmem:[#allocation4] sm:$0xff]  ;;  %v1350_v19 = vand.u32 127, %v545_v16  ;;  %s304_s9 = sand.u32 1, %s1066_s16   ;;  %p1448_p12 = scmp.ne.s32.totalorder %s1437_s11, 0 }
  0x8f   : > { %771 = vmatprep.subr.bf16.mxu0 %v770_v5  ;;  %v342_v13 = vsub.f32 %v394_v11, %v341_v12  ;;  %s317_s24 = scalar_select %p316_p2, %s1086_s21, 1  ;;  %v549_v24 = vstv %s544_s8  ;;  %v597_v63 = vshrl.u32 %v545_v16, 7 }
  0x90   : > { %773 = vmatpush1.bf16.msra.mxu0 %v772_v7  ;;  %780 = vmatpush3.bf16.msra.mxu1 %v784_v8  ;;  %v548_v22 = vadd.s32 256, %v1350_v19  ;;  %v547_v25 = vadd.s32 128, %v1350_v19  ;;  %v550_v28 = vadd.s32 %v549_v24, %v1350_v19  ;;  %s745_s14 = sshll.u32 %s304_s9, 3  ;;  %vm601_vm6 = vcmp.eq.s32.totalorder %v1350_v19, 1 }
  0x91   : > { %775 = vmatprep.subr.bf16.mxu0 %v774_v6  ;;  %781 = vmatprep.subr.bf16.mxu1 %v1099_v0  ;;  %v343_v14 = vmul.f32 %v342_v13, %v342_v13  ;;  %s318_s5 = smul.u32 3, %s317_s24  ;;  %vm598_vm5 = vcmp.eq.s32.totalorder %v597_v63, 0  ;;  %vm599_vm7 = vcmp.eq.s32.totalorder %v1350_v19, 0  ;;  %s750_s24 = sshll.u32 %s1086_s21, 7 }
  0x92   : > { %v552_v29 = vadd.s32 %v549_v24, %v548_v22  ;;  %v551_v31 = vadd.s32 %v549_v24, %v547_v25  ;;  %vm553_vm2 = vcmp.lt.s32.totalorder %v550_v28, 640  ;;  %vm602_vm8 = vmand %vm598_vm5, %vm601_vm6  ;;  %s1362_s8 = scalar_lea.hbm %s1423_s4, %s750_s24 }
  0x93   : > { %v345_v15 = vsel %vm344_vm1, %v343_v14, 0.0  ;;  %p323_p4 = scmp.lt.s32.totalorder %s318_s5, 4  ;;  %vm600_vm9 = vmand %vm598_vm5, %vm599_vm7 }
  0x94   : > { %777 = vmatpush1.bf16.msra.mxu0 %v776_v9  ;;  %783 = vmatpush3.bf16.msra.mxu1 %v785_v10  ;;  %vm555_vm3 = vcmp.lt.s32.totalorder %v552_v29, 640  ;;  %vm554_vm4 = vcmp.lt.s32.totalorder %v551_v31, 640 }
  0x95   : > { %346 = vadd.xlane.f32.xlu0 %v345_v15  ;;  %s1466_s5 = smov (!%p323_p4, %s318_s5), 4 }
  0x96   : > { %s746_s6 = sshll.u32 %s1466_s5, 1  ;;  %s306_s5 = scalar_lea.vmem [#allocation10], %s745_s14 }
  0x97   : > { %747 = vmatmul.mubr.msk.f32.vlgmr.msra.gmra.mrb[0].mxu0 %vm344_vm1, %v394_v11  ;;  %768 = vmatmul.mubr.msk.f32.vlgmr.msra.gmra.mrb[0].mxu1 %vm344_vm1, %v394_v11  ;;  %s326_s28 = scalar_lea.vmem %s1422_s3, %s746_s6  ;;  %s622_s6 = sshll.u32 %s306_s5, 4  ;;  %s1364_s6 = int_to_ptr.vmem [resolvable:$true] %s622_s6 }
  0x98   : > { %v357_v17 = vld [vmem:[%s326_s28] sm:$0x3f]  ;;  %s980_s21 = scalar_lea.vmem %s1364_s6, 128 }
  0x99   : > { %v358_v18 = vunpack.c.0.s8 %v357_v17  ;;  %v360_v20 = vunpack.c.2.s8 %v357_v17  ;;  %v359_v21 = vunpack.c.1.s8 %v357_v17  ;;  %p981_p9 = scmp.ne.s32.totalorder %s1364_s6, %s980_s21 }
  0x9b   : > { %v361_v23 = vcvt.s32.f32 %v358_v18  ;;  %v363_v26 = vcvt.s32.f32 %v360_v20  ;;  %v362_v27 = vcvt.s32.f32 %v359_v21  ;;  %p982_p8 = pnand %p981_p9, %p1448_p12 }
  0x9d   : > { %v391_v30 = vmul.f32 32.0, %v361_v23  ;;  %v393_v32 = vmul.f32 32.0, %v363_v26  ;;  %v392_v33 = vmul.f32 32.0, %v362_v27  ;;  %p983_p1 = pneg %p982_p8 }
 0x122   : > { %v347_v49 = vpop.xlane.xlu0 %346 }
 0x123   : > { %v348_v50 = vrot.slane %v347_v49, 4 }
 0x125   : > { %v349_v51 = vadd.f32 %v348_v50, %v347_v49 }
 0x127   : > { %v350_v52 = vrot.slane %v349_v51, 2 }
 0x129   : > { %v351_v53 = vadd.f32 %v350_v52, %v349_v51 }
 0x12b   : > { %v352_v54 = vrot.slane %v351_v53, 1 }
 0x12d   : > { %v353_v55 = vadd.f32 %v352_v54, %v351_v53 }
 0x12f   : > { %788 = vpush %v353_v55 }
 0x160   : > { %s789_s27 = spop %788 }
 0x161   : > { %s590_s10 = smul.f32 0.0001953125, %s789_s27  ;;  %s609_s27 = scalar_lea.sflag [#allocation6], %s304_s9 }
 0x163   : > { %s591_s29 = smul.f32 200.0, %s590_s10  ;;  %s1102_s10 = smov [#allocation10]  }
 0x165   : > { %s594_s26 = smul.f32 0.03125, %s591_s29  ;;  %s984_s29 = sshll.u32 %s1102_s10, 4  ;;  %s985_s29 = int_to_ptr.vmem [resolvable:$false] %s984_s29 }
 0x166   : > { %p987_p6 = scmp.lt.s32.totalorder %s1364_s6, %s985_s29 }
 0x167   : > { %s595_s25 = smul.f32 12.0, %s594_s26  ;;  %s986_s26 = scalar_lea.vmem %s985_s29, 256 }
 0x168   : > { %p988_p5 = scmp.lt.s32.totalorder %s986_s26, %s980_s21 }
 0x169   : > { %v603_v0 = vstv %s595_s25 }
 0x16a   : > { %v465_v34 = vpop.f32.mrb[0].mxu0  ;;  %v536_v35 = vpop.f32.mrb[0].mxu1  ;;  %v604_v1 = vsel %vm602_vm8, %v603_v0, 0.0  ;;  %p989_p3 = por %p988_p5, %p987_p6 }
 0x16b   : > { %v540_v36 = vsub.f32 %v391_v30, %v465_v34  ;;  %v467_v37 = vpop.f32.mrb[1].mxu0  ;;  %v542_v38 = vsub.f32 %v393_v32, %v536_v35  ;;  %v769_v39 = vpop.f32.mrb[1].mxu1 }
 0x16c   : > { %v541_v40 = vsub.f32 %v392_v33, %v467_v37  ;;  %p990_p11 = pnand %p989_p3, %p983_p1 }
 0x16d   : > { %v556_v41 = vsel %vm553_vm2, %v540_v36, 0.0  ;;  %v558_v42 = vsel %vm555_vm3, %v542_v38, 0.0 }
 0x16e   : > { %v559_v43 = vmul.f32 %v556_v41, %v556_v41  ;;  %v557_v44 = vsel %vm554_vm4, %v541_v40, 0.0  ;;  %v561_v46 = vmul.f32 %v558_v42, %v558_v42 }
 0x16f   : > { %v560_v45 = vmul.f32 %v557_v44, %v557_v44 }
 0x171   : > { %v562_v47 = vadd.f32 %v560_v45, %v559_v43 }
 0x173   : > { %v563_v48 = vadd.f32 %v562_v47, %v561_v46 }
 0x175   : > { %571 = vadd.xlane.f32.xlu0 %v563_v48 }
 0x202   : > { %v572_v56 = vpop.xlane.xlu0 %571 }
 0x203   : > { %v573_v57 = vrot.slane %v572_v56, 4 }
 0x205   : > { %v574_v58 = vadd.f32 %v573_v57, %v572_v56 }
 0x207   : > { %v575_v59 = vrot.slane %v574_v58, 2 }
 0x209   : > { %v576_v60 = vadd.f32 %v575_v59, %v574_v58 }
 0x20b   : > { %v577_v61 = vrot.slane %v576_v60, 1 }
 0x20d   : > { %v578_v62 = vadd.f32 %v577_v61, %v576_v60 }
 0x20f   : > { %790 = vpush %v578_v62 }
 0x240   : > { %s791_s18 = spop %790 }
 0x241   : > { %s582_s13 = smul.f32 0.0001953125, %s791_s18 }
 0x243   : > { %s585_s22 = smul.f32 0.03125, %s582_s13 }
 0x245   : > { %s586_s7 = smul.f32 12.0, %s585_s22 }
 0x247   : > { %v605_v2 = vstv %s586_s7 }
 0x248   : > { %v606_v3 = vsel %vm600_vm9, %v605_v2, %v604_v1 }
 0x249   : > { %607 = vst [vmem:[%s306_s5] sm:$0xff] %v606_v3 }
 0x24a   : > { %993 = shalt.err (!%p990_p11)
}
 0x24b   : > { %s994_s9 = scalar_lea.hbm %s1362_s8, 128  ;;  %s998_s18 = scalar_lea.hbm %s1423_s4, 256 }
 0x24c   : > { %p995_p13 = scmp.ne.s32.totalorder %s1362_s8, %s994_s9  ;;  %p999_p10 = scmp.lt.u32.totalorder %s1362_s8, %s1423_s4 }
 0x24d   : > { %p1000_p2 = scmp.lt.u32.totalorder %s998_s18, %s994_s9  ;;  %p1002_p9 = scmp.lt.u32.totalorder %s994_s9, %s1362_s8 }
 0x24e   : > { %p996_p7 = pnand %p995_p13, %p1448_p12 }
 0x24f   : > { %p1001_p4 = por %p1000_p2, %p999_p10 }
 0x250   : > { %p997_p0 = pneg %p996_p7 }
 0x251   : > { %p1003_p8 = por %p1002_p9, %p1001_p4 }
 0x253   : > { %p1004_p1 = pnand %p1003_p8, %p997_p0 }
 0x255   : > { %1007 = shalt.err (!%p1004_p1)
}
 0x256   : > { %801 = dma.vmem_to_hbm [thread:$0]  (%p1448_p12), %s1364_s6, 128, %s1362_s8, %s609_s27  }
 0x257 PF: > { %s634_s24 = sand.u32 1, %s1062_s15   ;;  %p1449_p6 = scmp.ne.s32.totalorder %s1438_s12, 0 }
 0x258   : > { %p1450_p5 = scmp.ge.s32.totalorder %s1094_s23, 2  ;;  %s635_s5 = scalar_lea.sflag [#allocation6], %s634_s24 }
 0x25a   : > { %p811_p3 = pnand %p1450_p5, %p1449_p6 }
 0x25c   : > { %1057 = dma.done.wait (!%p811_p3), %s635_s5, 128  }
 0x25d   : > { %1059 = vsyncadd (!%p811_p3), %s635_s5, 4294967168  ;;  %s19_s23 = sadd.s32 1, %s1094_s23   ;;  %s1451_s11 = sld [smem:[#allocation17_spill]] }
 0x25e   : > { %p16_p11 = scmp.ge.s32.totalorder %s19_s23, 4   ;;  %s1452_s6 = sld [smem:[#allocation18_spill]] }
 0x25f   : > { %s1453_s21 = sld [smem:[#allocation15_spill]]  ;;  %s1454_s22 = sld [smem:[#allocation16_spill]] }
 0x260   : > { %s1455_s15 = smov %s1066_s16  ;;  %s1456_s16 = smov %s1070_s17 }
 0x261   : > { %s1458_s18 = smov %s1078_s19  ;;  %s1459_s19 = smov %s1082_s20 }
 0x262   :  { %18 = sbr.rel (!%p16_p11) target bundleno = 8 (0x8), region = 100 }
 0x263   : > { %s1457_s17 = smov %s1451_s11 }
 0x264   : > { %s1460_s20 = smov %s1452_s6 }
 0x269   :  { %640 = vsyncpa [#allocation5], 1 }
 0x26a   :  { %642 = vsyncpa [#allocation5 + $0x1], 1 }
 0x26b   :  { %643 = vsyncpa [#allocation8], 1 }
 0x26c   :  { %644 = vsyncpa [#allocation6], 1 }
 0x26d   :  { %646 = vsyncpa [#allocation6 + $0x1], 1 }

</bundles_post_ra>
